<compile_context>
chip_gen: v7x
topology: tpu7x:2x2x1
jax: 0.10.0
libtpu: 0.0.40
codegen_flags: <defaults>
</compile_context>

<pallas_src>
import math

import jax
import jax.numpy as jnp
from jax.experimental import pallas as pl
from jax.experimental.pallas import tpu as pltpu


def _logprob_kernel(const_ref, z_ref, scale_ref, bias_ref, out_ref):
    # const_ref: (1, 1)  SMEM   scalar  = sum(-log std) - 0.5*M*log(2*pi)
    # z_ref:     (TB, M) VMEM   tile of latents
    # scale_ref: (1, M)  VMEM   resident = (1/std) * sqrt(0.5)
    # bias_ref:  (1, M)  VMEM   resident = -mean * (1/std) * sqrt(0.5)
    # out_ref:   (TB, 1) VMEM   per-row log_prob
    x = z_ref[...] * scale_ref[...] + bias_ref[...]
    out_ref[...] = const_ref[0, 0] - jnp.sum(x * x, axis=-1, keepdims=True)


def _choose_batch_tile(B, M):
    """Pick a batch tile: ~4 MiB of z per buffer, multiple of 8 sublanes."""
    target_bytes = 4 * 1024 * 1024
    tb = target_bytes // (4 * max(M, 1))
    tb = max(8, min(1024, (tb // 8) * 8))
    b_pad8 = -(-B // 8) * 8          # B rounded up to a multiple of 8
    return min(tb, b_pad8)


def gaussian_prior_log_prob(z, mean, std):
    """log_prob of z under Independent(Normal(mean, std), 1).

    z: [B, M]; mean/std: [M]. Returns [B] float32.
    """
    B, M = z.shape
    z = z.astype(jnp.float32)
    mean = mean.astype(jnp.float32)
    std = std.astype(jnp.float32)

    # Fold divide / log / constants into precomputed per-feature & scalar terms.
    inv_std = 1.0 / std
    scale = (inv_std * jnp.float32(math.sqrt(0.5))).reshape(1, M)
    bias = (-mean * inv_std * jnp.float32(math.sqrt(0.5))).reshape(1, M)
    const = (jnp.sum(-jnp.log(std))
             - jnp.float32(0.5 * M * math.log(2.0 * math.pi))).reshape(1, 1)

    # Batch tiling (pad B up to a multiple of the tile; slice off afterwards).
    TB = _choose_batch_tile(B, M)
    grid_b = -(-B // TB)
    Bp = grid_b * TB
    if Bp != B:
        z = jnp.pad(z, ((0, Bp - B), (0, 0)))

    out = pl.pallas_call(
        _logprob_kernel,
        out_shape=jax.ShapeDtypeStruct((Bp, 1), jnp.float32),
        grid=(grid_b,),
        in_specs=[
            pl.BlockSpec(memory_space=pltpu.MemorySpace.SMEM),   # const (1,1)
            pl.BlockSpec((TB, M), lambda i: (i, 0)),             # z tile
            pl.BlockSpec((1, M), lambda i: (0, 0)),              # scale (resident)
            pl.BlockSpec((1, M), lambda i: (0, 0)),              # bias  (resident)
        ],
        out_specs=pl.BlockSpec((TB, 1), lambda i: (i, 0)),
        compiler_params=pltpu.CompilerParams(
            dimension_semantics=("parallel",)),
    )(const, z, scale, bias)
    # TODO(synk): for extremely wide M (TB*M*4 > VMEM even at TB=8), a second
    # "arbitrary" reduction axis over M with an accumulator would be needed.
    return out[:B, 0]


class GaussianPrior:
    """JAX/Pallas port of the PyTorch GaussianPrior module."""

    def __init__(self, M):
        self.M = M
        # Deterministic parameter init, exactly as nn.Parameter(torch.zeros/ones).
        self.mean = jnp.zeros((M,), dtype=jnp.float32)
        self.std = jnp.ones((M,), dtype=jnp.float32)

    def forward(self):
        # TODO(synk): torch.distributions.Independent/Normal object construction
        # has no Pallas equivalent; we expose the distribution's log_prob as the
        # kernel and return self as the "distribution" handle.
        return self

    __call__ = forward

    def log_prob(self, z):
        return gaussian_prior_log_prob(z, self.mean, self.std)


if __name__ == "__main__":
    key = jax.random.PRNGKey(0)
    B, M = 8, 32  # small latent batch

    prior = GaussianPrior(M)
    dist = prior()  # forward() — returns the prior "distribution"

    z = jax.random.normal(key, (B, M), dtype=jnp.float32)

    lp = dist.log_prob(z)
    lp = jax.block_until_ready(lp)

    # Reference check in plain JAX (standard normal, summed over event dim).
    ref = jnp.sum(-0.5 * z * z - 0.5 * jnp.log(2.0 * jnp.pi), axis=-1)
    assert lp.shape == (B,)
    assert jnp.allclose(lp, ref, atol=1e-4, rtol=1e-4)

    # Also exercise a non-tile-multiple batch to check padding/slicing path.
    z2 = jax.random.normal(jax.random.PRNGKey(1), (5, M), dtype=jnp.float32)
    lp2 = jax.block_until_ready(dist.log_prob(z2))
    ref2 = jnp.sum(-0.5 * z2 * z2 - 0.5 * jnp.log(2.0 * jnp.pi), axis=-1)
    assert lp2.shape == (5,)
    assert jnp.allclose(lp2, ref2, atol=1e-4, rtol=1e-4)

    print("KERNEL_OK")
</pallas_src>

<mosaic_0001>
module attributes {stable_mosaic.version = 11 : i64} {
  func.func @_logprob_kernel(%arg0: i32, %arg1: memref<1x1xf32, #tpu.memory_space<smem>>, %arg2: memref<8x32xf32, #tpu.memory_space<vmem>>, %arg3: memref<1x32xf32, #tpu.memory_space<vmem>>, %arg4: memref<1x32xf32, #tpu.memory_space<vmem>>, %arg5: memref<8x1xf32, #tpu.memory_space<vmem>>) attributes {dimension_semantics = [#tpu.dimension_semantics<parallel>], iteration_bounds = array<i64: 1>, scalar_prefetch = 0 : i64, scratch_operands = 0 : i64, tpu.core_type = #tpu.core_type<tc>, window_params = [{transform_indices = @transform_0, window_bounds = array<i64: 1, 1>}, {transform_indices = @transform_1, window_bounds = array<i64: 8, 32>}, {pipeline_mode = #tpu.pipeline_mode<synchronous>, transform_indices = @transform_2, window_bounds = array<i64: 1, 32>}, {pipeline_mode = #tpu.pipeline_mode<synchronous>, transform_indices = @transform_3, window_bounds = array<i64: 1, 32>}, {transform_indices = @transform_4, window_bounds = array<i64: 8, 1>}]} {
    %c0 = arith.constant 0 : index
    %c0_0 = arith.constant 0 : index
    %0 = vector.load %arg2[%c0, %c0_0] : memref<8x32xf32, #tpu.memory_space<vmem>>, vector<8x32xf32>
    %c0_1 = arith.constant 0 : index
    %c0_2 = arith.constant 0 : index
    %1 = vector.load %arg3[%c0_1, %c0_2] : memref<1x32xf32, #tpu.memory_space<vmem>>, vector<1x32xf32>
    %2 = vector.broadcast %1 : vector<1x32xf32> to vector<8x32xf32>
    %3 = arith.mulf %0, %2 : vector<8x32xf32>
    %c0_3 = arith.constant 0 : index
    %c0_4 = arith.constant 0 : index
    %4 = vector.load %arg4[%c0_3, %c0_4] : memref<1x32xf32, #tpu.memory_space<vmem>>, vector<1x32xf32>
    %5 = vector.broadcast %4 : vector<1x32xf32> to vector<8x32xf32>
    %6 = arith.addf %3, %5 : vector<8x32xf32>
    %c0_5 = arith.constant 0 : index
    %c0_6 = arith.constant 0 : index
    %7 = memref.load %arg1[%c0_5, %c0_6] : memref<1x1xf32, #tpu.memory_space<smem>>
    %8 = arith.mulf %6, %6 : vector<8x32xf32>
    %cst = arith.constant dense<0.000000e+00> : vector<8xf32>
    %9 = vector.multi_reduction <add>, %8, %cst [1] : vector<8x32xf32> to vector<8xf32>
    %10 = vector.shape_cast %9 : vector<8xf32> to vector<8x1xf32>
    %11 = vector.broadcast %7 : f32 to vector<8x1xf32>
    %12 = arith.subf %11, %10 : vector<8x1xf32>
    %c0_7 = arith.constant 0 : index
    %c0_8 = arith.constant 0 : index
    %13 = vector.load %arg5[%c0_7, %c0_8] : memref<8x1xf32, #tpu.memory_space<vmem>>, vector<8x1xf32>
    tpu.vector_store %arg5[%c0_7, %c0_8], %12 {strides = array<i32>} : memref<8x1xf32, #tpu.memory_space<vmem>>, vector<8x1xf32>,
    return
  }
  func.func @transform_0(%arg0: i32) -> (i32, i32) {
    %c0_i32 = arith.constant 0 : i32
    %c0_i32_0 = arith.constant 0 : i32
    %c0_i32_1 = arith.constant 0 : i32
    return %c0_i32, %c0_i32_0 : i32, i32
  }
  func.func @transform_1(%arg0: i32) -> (i32, i32) {
    %c0_i32 = arith.constant 0 : i32
    %c0_i32_0 = arith.constant 0 : i32
    return %arg0, %c0_i32 : i32, i32
  }
  func.func @transform_2(%arg0: i32) -> (i32, i32) {
    %c0_i32 = arith.constant 0 : i32
    %c0_i32_0 = arith.constant 0 : i32
    %c0_i32_1 = arith.constant 0 : i32
    return %c0_i32, %c0_i32_0 : i32, i32
  }
  func.func @transform_3(%arg0: i32) -> (i32, i32) {
    %c0_i32 = arith.constant 0 : i32
    %c0_i32_0 = arith.constant 0 : i32
    %c0_i32_1 = arith.constant 0 : i32
    return %c0_i32, %c0_i32_0 : i32, i32
  }
  func.func @transform_4(%arg0: i32) -> (i32, i32) {
    %c0_i32 = arith.constant 0 : i32
    %c0_i32_0 = arith.constant 0 : i32
    return %arg0, %c0_i32 : i32, i32
  }
}

</mosaic_0001>

<bundles_post_ra>
// kernel: tpu_custom_call.1
= control target key start
LH: loop header
LB: loop body
LE: loop exit
PB: predicated region body
PF: predicated region fallthrough
CT: control target
= control target key end

     0   :  { %10 = vsyncpa [#allocation4], 0  ;;  %s89_s15 = smov [#allocation3]   ;;  %s139_s0 = inlined_call_operand.<no memory space> [shape: f32[1,1], index: 0, kind: input, shape index: {}]   ;;  %s140_s1 = inlined_call_operand.hbm [shape: f32[8,32], index: 1, kind: input, shape index: {}]   ;;  %s141_s2 = inlined_call_operand.vmem [shape: f32[1,32], index: 2, kind: input, shape index: {}]   ;;  %s142_s3 = inlined_call_operand.vmem [shape: f32[1,32], index: 3, kind: input, shape index: {}]   ;;  %s143_s4 = inlined_call_operand.vmem [shape: f32[8,1], index: 4, kind: output, shape index: {}]  }
   0x1   :  { %s19_s16 = sshll.u32 %s89_s15, 4  ;;  %s65_s19 = scalar_lea.hbm %s140_s1, 128  ;;  %s20_s16 = int_to_ptr.vmem [resolvable:$true] %s19_s16 }
   0x2   :  { %p66_p0 = scmp.ne.s32.totalorder %s140_s1, %s65_s19  ;;  %p69_p1 = scmp.lt.u32.totalorder %s65_s19, %s140_s1 }
   0x4   :  { %p71_p2 = pnand %p69_p1, %p66_p0 }
   0x6   :  { %74 = shalt.err (!%p71_p2)
}
   0x7   :  { %s75_s24 = scalar_lea.vmem %s20_s16, 128  ;;  %p80_p4 = scmp.lt.s32.totalorder %s20_s16, %s20_s16 }
   0x8   :  { %p76_p3 = scmp.ne.s32.totalorder %s20_s16, %s75_s24  ;;  %p81_p5 = scmp.lt.s32.totalorder %s75_s24, %s75_s24 }
   0xa   :  { %p82_p6 = por %p81_p5, %p80_p4 }
   0xc   :  { %p83_p7 = pnand %p82_p6, %p76_p3 }
   0xe   :  { %86 = shalt.err (!%p83_p7)
}
   0xf   :  { %22 = dma.hbm_to_vmem [thread:$0]  %s140_s1, 128, %s20_s16, [#allocation4]  }
  0x10   :  { %87 = dma.done.wait [#allocation4], 128  }
  0x11   :  { %88 = vsyncadd [#allocation4], 4294967168  ;;  %v30_v0 = vld [vmem:[#allocation3] sm:$0xff]  ;;  %vm49_vm0 = vcmask 261120   ;;  %v53_v7 = vstv %s139_s0  ;;  %vm55_vm1 = vcmask 7168  }
  0x12   :  { %v62_v1 = vld [vmem:[%s141_s2] ss:$0 sm:$0xff] }
  0x13   :  { %v63_v2 = vld [vmem:[%s142_s3] ss:$0 sm:$0xff]  ;;  %v38_v3 = vmul.f32 %v62_v1, %v30_v0 }
  0x15   :  { %v46_v4 = vadd.f32 %v63_v2, %v38_v3 }
  0x17   :  { %v48_v5 = vmul.f32 %v46_v4, %v46_v4 }
  0x19   :  { %v50_v6 = vsel %vm49_vm0, %v48_v5, 0.0 }
  0x1a   :  { %51 = vadd.xlane.f32.xlu0 %v50_v6 }
  0xa7   :  { %v52_v8 = vpop.xlane.xlu0 %51 }
  0xa8   :  { %v54_v9 = vsub.f32 %v53_v7, %v52_v8 }
  0xaa   :  { %56 = vst.msk [vmem:[%s143_s4] sm:$0xff] %vm55_vm1, %v54_v9 }
  0xab   :  { %61 = vsyncpa [#allocation4], 1 }

</bundles_post_ra>
